<compile_context>
chip_gen: v5e
topology: v5e:2x2
jax: 0.10.0
libtpu: 0.0.40
codegen_flags: <defaults>
</compile_context>

<pallas_src>
import functools

import jax
import jax.numpy as jnp
from jax.experimental import pallas as pl
from jax.experimental.pallas import tpu as pltpu


# ----------------------------- kernels --------------------------------------


def _relu6(v):
    return jnp.minimum(jnp.maximum(v, 0.0), 6.0)


def _se_kernel(x_ref, w1_ref, b1_ref, w2_ref, b2_ref, o_ref):
    # x_ref : (Bt, C, HW)     w1_ref: (C, M) (pre-scaled by 1/HW on host)
    # b1_ref: (1, M)          w2_ref: (M, C)   b2_ref: (1, C)
    # o_ref : (Bt, C, HW)
    #
    # AdaptiveAvgPool2d(1) == sum over spatial (1/HW folded into w1); f32 acc.
    pooled = jnp.sum(x_ref[...], axis=-1, dtype=jnp.float32)            # (Bt, C)

    # SE gate: Linear -> ReLU6 -> Linear -> ReLU6 (matches the PyTorch module).
    h = _relu6(jnp.dot(pooled, w1_ref[...].astype(jnp.float32),
                       preferred_element_type=jnp.float32)
               + b1_ref[...].astype(jnp.float32))
    s = _relu6(jnp.dot(h, w2_ref[...].astype(jnp.float32),
                       preferred_element_type=jnp.float32)
               + b2_ref[...].astype(jnp.float32))

    # Re-read the input block (no f32 slab held across the reduction), multiply
    # in f32 and cast only at the store.
    o_ref[...] = (x_ref[...].astype(jnp.float32) * s[:, :, None]).astype(o_ref.dtype)


def _make_pool_kernel(HW, Thw):
    """Chunked pooled-sum kernel: grid = (batch, HW chunks)."""
    needs_mask = (HW % Thw) != 0

    def kernel(x_ref, pooled_ref):
        # x_ref: (1, C, Thw)   pooled_ref: (1, 1, C) f32 (resident across hw axis)
        hw_i = pl.program_id(1)

        @pl.when(hw_i == 0)
        def _init():
            pooled_ref[...] = jnp.zeros_like(pooled_ref)

        xb = x_ref[...].astype(jnp.float32)
        if needs_mask:
            lane = jax.lax.broadcasted_iota(jnp.int32, xb.shape, 2)
            xb = jnp.where(lane + hw_i * Thw < HW, xb, 0.0)
        pooled_ref[...] += jnp.sum(xb, axis=-1)[:, None, :]

    return kernel


def _scale_kernel(x_ref, s_ref, o_ref):
    # x_ref: (1, C, Thw)   s_ref: (1, C, 1) f32   o_ref: (1, C, Thw)
    o_ref[...] = (x_ref[...].astype(jnp.float32) * s_ref[...]).astype(o_ref.dtype)


# ----------------------------- tiling policy ---------------------------------


def _round_up(a, m):
    return (a + m - 1) // m * m


def _sublane_pack(itemsize):
    # 8 sublanes for 32-bit, 16 for 16-bit, 32 for 8-bit.
    return 8 * max(1, 4 // itemsize)


def _vmem_capacity_bytes():
    try:
        info = pltpu.get_tpu_info()
        cap = int(getattr(info, "vmem_capacity_bytes", 0) or 0)
        if cap > 0:
            return cap
    except Exception:
        pass
    return 64 * 1024 * 1024  # v7x floor -> safe default on every generation


def _pick_bt(B, img_bytes, act_budget):
    """Images per grid step; 0 means 'one image does not fit -> chunk over HW'."""
    bt_cap = act_budget // (4 * img_bytes)      # 2 input + 2 output double-buffers
    if bt_cap < 1:
        return 0
    bt_floor = -(-(512 * 1024) // img_bytes)    # keep tiles >= ~0.5 MiB
    bt_steps = max(1, B // 8)                   # ~8 grid steps when B allows
    bt = max(bt_floor, bt_steps)                #  (>= 3-4 per TC on v7x)
    return int(max(1, min(bt, bt_cap, B)))


# ----------------------------- wrapper ---------------------------------------


@functools.partial(jax.jit, static_argnames=("act_budget_bytes",))
def squeeze_and_excite(x, w1, b1, w2, b2, *, act_budget_bytes=None):
    """x: (B, C, H, W).  w1: (C, M), b1: (1, M), w2: (M, C), b2: (1, C)."""
    B, C, H, W = x.shape
    HW = H * W
    M = w1.shape[1]
    itemsize = x.dtype.itemsize

    phys_vmem = _vmem_capacity_bytes()
    act_budget = (act_budget_bytes if act_budget_bytes is not None
                  else min(phys_vmem // 2, 96 * 1024 * 1024))
    vmem_limit = int(min((phys_vmem * 3) // 4, 96 * 1024 * 1024))

    # Metadata-only reshape (no HBM traffic); NO pad / slice around the kernel.
    x_flat = x.reshape(B, C, HW)

    pack = _sublane_pack(itemsize)
    img_bytes = _round_up(C, pack) * _round_up(HW, 128) * itemsize  # VMEM-padded
    Bt = _pick_bt(B, img_bytes, act_budget)

    if Bt >= 1:
        # ------------------- single-pass streaming kernel -------------------
        w1_scaled = (w1.astype(jnp.float32) * (1.0 / HW)).astype(w1.dtype)
        grid = (pl.cdiv(B, Bt),)
        cost = pl.CostEstimate(
            flops=2 * B * C * HW + 4 * B * C * M,
            transcendentals=0,
            bytes_accessed=2 * B * C * HW * itemsize
            + (C * M + M + M * C + C) * itemsize,
        )
        out_flat = pl.pallas_call(
            _se_kernel,
            out_shape=jax.ShapeDtypeStruct((B, C, HW), x.dtype),
            grid_spec=pltpu.PrefetchScalarGridSpec(
                num_scalar_prefetch=0,
                grid=grid,
                in_specs=[
                    pl.BlockSpec((Bt, C, HW), lambda b: (b, 0, 0)),  # x tile
                    pl.BlockSpec((C, M), lambda b: (0, 0)),          # fc1 weight
                    pl.BlockSpec((1, M), lambda b: (0, 0)),          # fc1 bias
                    pl.BlockSpec((M, C), lambda b: (0, 0)),          # fc2 weight
                    pl.BlockSpec((1, C), lambda b: (0, 0)),          # fc2 bias
                ],
                out_specs=pl.BlockSpec((Bt, C, HW), lambda b: (b, 0, 0)),
            ),
            compiler_params=pltpu.CompilerParams(
                dimension_semantics=("parallel",),
                vmem_limit_bytes=vmem_limit,
            ),
            cost_estimate=cost,
        )(x_flat, w1_scaled, b1, w2, b2)
        return out_flat.reshape(B, C, H, W)

    # --------- fallback: one image tile exceeds the VMEM budget ------------
    # Chunk along HW. Two streaming passes over x are required because the
    # full pooled mean must exist before any output element can be scaled.
    c_pad = _round_up(C, pack)
    thw_cap = (act_budget // (4 * c_pad * itemsize)) // 128 * 128
    Thw = int(min(_round_up(HW, 128), max(128, thw_cap)))
    nhw = pl.cdiv(HW, Thw)

    pooled = pl.pallas_call(
        _make_pool_kernel(HW, Thw),
        out_shape=jax.ShapeDtypeStruct((B, 1, C), jnp.float32),
        grid_spec=pltpu.PrefetchScalarGridSpec(
            num_scalar_prefetch=0,
            grid=(B, nhw),
            in_specs=[pl.BlockSpec((1, C, Thw), lambda b, h: (b, 0, h))],
            out_specs=pl.BlockSpec((1, 1, C), lambda b, h: (b, 0, 0)),
        ),
        compiler_params=pltpu.CompilerParams(
            dimension_semantics=("parallel", "arbitrary"),
            vmem_limit_bytes=vmem_limit,
        ),
    )(x_flat)

    # Tiny (B, C) SE gate: negligible work, done in plain JAX/f32.
    pooled2 = pooled[:, 0, :] * (1.0 / HW)
    hmid = _relu6(pooled2 @ w1.astype(jnp.float32) + b1.astype(jnp.float32))
    s = _relu6(hmid @ w2.astype(jnp.float32) + b2.astype(jnp.float32))
    s3 = s[:, :, None]                                              # (B, C, 1)

    out_flat = pl.pallas_call(
        _scale_kernel,
        out_shape=jax.ShapeDtypeStruct((B, C, HW), x.dtype),
        grid_spec=pltpu.PrefetchScalarGridSpec(
            num_scalar_prefetch=0,
            grid=(B, nhw),
            in_specs=[
                pl.BlockSpec((1, C, Thw), lambda b, h: (b, 0, h)),
                pl.BlockSpec((1, C, 1), lambda b, h: (b, 0, 0)),
            ],
            out_specs=pl.BlockSpec((1, C, Thw), lambda b, h: (b, 0, h)),
        ),
        compiler_params=pltpu.CompilerParams(
            dimension_semantics=("parallel", "arbitrary"),
            vmem_limit_bytes=vmem_limit,
        ),
    )(x_flat, s3)
    return out_flat.reshape(B, C, H, W)


# ----------------------------- reference & test -------------------------------


def _reference(x, w1, b1, w2, b2):
    xf = x.astype(jnp.float32)
    pooled = jnp.mean(xf, axis=(2, 3))                               # (B, C)
    h = _relu6(pooled @ w1.astype(jnp.float32) + b1.astype(jnp.float32))
    s = _relu6(h @ w2.astype(jnp.float32) + b2.astype(jnp.float32))
    return xf * s[:, :, None, None]


def _make_inputs(key, B, C, H, W, divide, dtype):
    kx, k1, k2, k3, k4 = jax.random.split(key, 5)
    M = max(1, C // divide)
    x = jax.random.normal(kx, (B, C, H, W), dtype=jnp.float32).astype(dtype)
    # nn.Linear(C, M): weight (M, C) applied as x @ W.T + b -> stored as (C, M).
    w1 = (jax.random.normal(k1, (C, M), dtype=jnp.float32) * 0.5).astype(dtype)
    b1 = (jax.random.normal(k2, (1, M), dtype=jnp.float32) * 0.1).astype(dtype)
    w2 = (jax.random.normal(k3, (M, C), dtype=jnp.float32) * 0.5).astype(dtype)
    b2 = (jax.random.normal(k4, (1, C), dtype=jnp.float32) * 0.1).astype(dtype)
    return x, w1, b1, w2, b2


if __name__ == "__main__":
    key = jax.random.PRNGKey(0)
    k_main, k_chunk, k_bf16 = jax.random.split(key, 3)

    # 1) Main single-pass path, f32, small shape (HW not required to be 128-mult).
    x, w1, b1, w2, b2 = _make_inputs(k_main, 2, 4, 16, 16, divide=4, dtype=jnp.float32)
    out = squeeze_and_excite(x, w1, b1, w2, b2)
    jax.block_until_ready(out)
    ref = _reference(x, w1, b1, w2, b2)
    assert jnp.allclose(out, ref, atol=1e-5, rtol=1e-5), "main path mismatch"

    # 2) HW-chunked fallback path, forced with a tiny activation budget, with a
    #    ragged HW (225) so the tail masking is exercised.
    xc, w1c, b1c, w2c, b2c = _make_inputs(k_chunk, 2, 8, 15, 15, divide=4,
                                          dtype=jnp.float32)
    outc = squeeze_and_excite(xc, w1c, b1c, w2c, b2c, act_budget_bytes=4096)
    jax.block_until_ready(outc)
    refc = _reference(xc, w1c, b1c, w2c, b2c)
    assert jnp.allclose(outc, refc, atol=1e-5, rtol=1e-5), "chunked path mismatch"

    # 3) bf16 sanity (main path): loose tolerance vs an f32 reference of the
    #    bf16-quantized inputs.
    xb, w1b, b1b, w2b, b2b = _make_inputs(k_bf16, 2, 4, 16, 16, divide=4,
                                          dtype=jnp.bfloat16)
    outb = squeeze_and_excite(xb, w1b, b1b, w2b, b2b)
    jax.block_until_ready(outb)
    refb = _reference(xb, w1b, b1b, w2b, b2b)
    assert jnp.allclose(outb.astype(jnp.float32), refb, atol=0.1, rtol=0.1), \
        "bf16 path mismatch"

    print("KERNEL_OK")
</pallas_src>

<mosaic_0001>
module attributes {stable_mosaic.version = 11 : i64} {
  func.func @_se_kernel(%arg0: i32, %arg1: memref<2x4x256xf32, #tpu.memory_space<vmem>>, %arg2: memref<4x1xf32, #tpu.memory_space<vmem>>, %arg3: memref<1x1xf32, #tpu.memory_space<vmem>>, %arg4: memref<1x4xf32, #tpu.memory_space<vmem>>, %arg5: memref<1x4xf32, #tpu.memory_space<vmem>>, %arg6: memref<2x4x256xf32, #tpu.memory_space<vmem>>) attributes {dimension_semantics = [#tpu.dimension_semantics<parallel>], iteration_bounds = array<i64: 1>, scalar_prefetch = 0 : i64, scratch_operands = 0 : i64, tpu.core_type = #tpu.core_type<tc>, window_params = [{transform_indices = @transform_0, window_bounds = array<i64: 2, 4, 256>}, {pipeline_mode = #tpu.pipeline_mode<synchronous>, transform_indices = @transform_1, window_bounds = array<i64: 4, 1>}, {pipeline_mode = #tpu.pipeline_mode<synchronous>, transform_indices = @transform_2, window_bounds = array<i64: 1, 1>}, {pipeline_mode = #tpu.pipeline_mode<synchronous>, transform_indices = @transform_3, window_bounds = array<i64: 1, 4>}, {pipeline_mode = #tpu.pipeline_mode<synchronous>, transform_indices = @transform_4, window_bounds = array<i64: 1, 4>}, {transform_indices = @transform_5, window_bounds = array<i64: 2, 4, 256>}]} {
    %c0 = arith.constant 0 : index
    %c0_0 = arith.constant 0 : index
    %c0_1 = arith.constant 0 : index
    %0 = vector.load %arg1[%c0, %c0_0, %c0_1] : memref<2x4x256xf32, #tpu.memory_space<vmem>>, vector<2x4x256xf32>
    %cst = arith.constant dense<0.000000e+00> : vector<2x4xf32>
    %1 = vector.multi_reduction <add>, %0, %cst [2] : vector<2x4x256xf32> to vector<2x4xf32>
    %c0_2 = arith.constant 0 : index
    %c0_3 = arith.constant 0 : index
    %2 = vector.load %arg2[%c0_2, %c0_3] : memref<4x1xf32, #tpu.memory_space<vmem>>, vector<4x1xf32>
    %cst_4 = arith.constant dense<0.000000e+00> : vector<2x1xf32>
    %3 = tpu.matmul %1, %2, %cst_4 {dimension_numbers = #tpu.dot_dimension_numbers<[1], [0], [0], [1], [0, 0, 1, 1], [], []>} : vector<2x4xf32>, vector<4x1xf32>, vector<2x1xf32> -> vector<2x1xf32>
    %c0_5 = arith.constant 0 : index
    %c0_6 = arith.constant 0 : index
    %4 = vector.load %arg3[%c0_5, %c0_6] : memref<1x1xf32, #tpu.memory_space<vmem>>, vector<1x1xf32>
    %5 = vector.broadcast %4 : vector<1x1xf32> to vector<2x1xf32>
    %6 = arith.addf %3, %5 : vector<2x1xf32>
    %cst_7 = arith.constant 0.000000e+00 : f32
    %7 = vector.broadcast %cst_7 : f32 to vector<2x1xf32>
    %8 = arith.maximumf %6, %7 : vector<2x1xf32>
    %cst_8 = arith.constant 6.000000e+00 : f32
    %9 = vector.broadcast %cst_8 : f32 to vector<2x1xf32>
    %10 = arith.minimumf %8, %9 : vector<2x1xf32>
    %c0_9 = arith.constant 0 : index
    %c0_10 = arith.constant 0 : index
    %11 = vector.load %arg4[%c0_9, %c0_10] : memref<1x4xf32, #tpu.memory_space<vmem>>, vector<1x4xf32>
    %cst_11 = arith.constant dense<0.000000e+00> : vector<2x4xf32>
    %12 = tpu.matmul %10, %11, %cst_11 {dimension_numbers = #tpu.dot_dimension_numbers<[1], [0], [0], [1], [0, 0, 1, 1], [], []>} : vector<2x1xf32>, vector<1x4xf32>, vector<2x4xf32> -> vector<2x4xf32>
    %c0_12 = arith.constant 0 : index
    %c0_13 = arith.constant 0 : index
    %13 = vector.load %arg5[%c0_12, %c0_13] : memref<1x4xf32, #tpu.memory_space<vmem>>, vector<1x4xf32>
    %14 = vector.broadcast %13 : vector<1x4xf32> to vector<2x4xf32>
    %15 = arith.addf %12, %14 : vector<2x4xf32>
    %cst_14 = arith.constant 0.000000e+00 : f32
    %16 = vector.broadcast %cst_14 : f32 to vector<2x4xf32>
    %17 = arith.maximumf %15, %16 : vector<2x4xf32>
    %cst_15 = arith.constant 6.000000e+00 : f32
    %18 = vector.broadcast %cst_15 : f32 to vector<2x4xf32>
    %19 = arith.minimumf %17, %18 : vector<2x4xf32>
    %c0_16 = arith.constant 0 : index
    %c0_17 = arith.constant 0 : index
    %c0_18 = arith.constant 0 : index
    %20 = vector.load %arg1[%c0_16, %c0_17, %c0_18] : memref<2x4x256xf32, #tpu.memory_space<vmem>>, vector<2x4x256xf32>
    %21 = vector.shape_cast %19 : vector<2x4xf32> to vector<2x4x1xf32>
    %22 = vector.broadcast %21 : vector<2x4x1xf32> to vector<2x4x256xf32>
    %23 = arith.mulf %20, %22 : vector<2x4x256xf32>
    %c0_19 = arith.constant 0 : index
    %c0_20 = arith.constant 0 : index
    %c0_21 = arith.constant 0 : index
    %24 = vector.load %arg6[%c0_19, %c0_20, %c0_21] : memref<2x4x256xf32, #tpu.memory_space<vmem>>, vector<2x4x256xf32>
    tpu.vector_store %arg6[%c0_19, %c0_20, %c0_21], %23 {strides = array<i32>} : memref<2x4x256xf32, #tpu.memory_space<vmem>>, vector<2x4x256xf32>,
    return
  }
  func.func @transform_0(%arg0: i32) -> (i32, i32, i32) {
    %c0_i32 = arith.constant 0 : i32
    %c0_i32_0 = arith.constant 0 : i32
    %c0_i32_1 = arith.constant 0 : i32
    return %arg0, %c0_i32, %c0_i32_0 : i32, i32, i32
  }
  func.func @transform_1(%arg0: i32) -> (i32, i32) {
    %c0_i32 = arith.constant 0 : i32
    %c0_i32_0 = arith.constant 0 : i32
    %c0_i32_1 = arith.constant 0 : i32
    return %c0_i32, %c0_i32_0 : i32, i32
  }
  func.func @transform_2(%arg0: i32) -> (i32, i32) {
    %c0_i32 = arith.constant 0 : i32
    %c0_i32_0 = arith.constant 0 : i32
    %c0_i32_1 = arith.constant 0 : i32
    return %c0_i32, %c0_i32_0 : i32, i32
  }
  func.func @transform_3(%arg0: i32) -> (i32, i32) {
    %c0_i32 = arith.constant 0 : i32
    %c0_i32_0 = arith.constant 0 : i32
    %c0_i32_1 = arith.constant 0 : i32
    return %c0_i32, %c0_i32_0 : i32, i32
  }
  func.func @transform_4(%arg0: i32) -> (i32, i32) {
    %c0_i32 = arith.constant 0 : i32
    %c0_i32_0 = arith.constant 0 : i32
    %c0_i32_1 = arith.constant 0 : i32
    return %c0_i32, %c0_i32_0 : i32, i32
  }
  func.func @transform_5(%arg0: i32) -> (i32, i32, i32) {
    %c0_i32 = arith.constant 0 : i32
    %c0_i32_0 = arith.constant 0 : i32
    %c0_i32_1 = arith.constant 0 : i32
    return %arg0, %c0_i32, %c0_i32_0 : i32, i32, i32
  }
}

</mosaic_0001>

<bundles_post_ra>
// kernel: squeeze_and_excite.1
= control target key start
LH: loop header
LB: loop body
LE: loop exit
PB: predicated region body
PF: predicated region fallthrough
CT: control target
= control target key end

     0   :  { %vm37_vm0 = vcmask 1043456   ;;  %v55_v15 = vlaneseq  ;;  %vm59_vm1 = vcmask 1041409   ;;  %vm61_vm2 = vcmask 31744   ;;  %s235_s0 = inlined_call_operand.vmem [shape: f32[2,4,256], index: 0, kind: input, shape index: {}]   ;;  %s236_s1 = inlined_call_operand.vmem [shape: f32[4,1], index: 1, kind: input, shape index: {}]   ;;  %s237_s2 = inlined_call_operand.<no memory space> [shape: f32[1,1], index: 2, kind: input, shape index: {}]   ;;  %s238_s4 = inlined_call_operand.vmem [shape: f32[1,4], index: 4, kind: input, shape index: {}]   ;;  %s239_s3 = inlined_call_operand.vmem [shape: f32[1,4], index: 3, kind: input, shape index: {}]   ;;  %s240_s5 = inlined_call_operand.vmem [shape: f32[2,4,256], index: 5, kind: output, shape index: {}]  }
   0x1   :  { %v201_v0 = vld [vmem:[%s235_s0] sm:$0xff]  ;;  %v206_v1 = vld [vmem:[%s235_s0 + $0x8] sm:$0xff]  ;;  %v10_v13 = vstv %s237_s2  ;;  %vm98_vm3 = vcmask 1040384   ;;  %vm94_vm4 = vcmask 7168   ;;  %v167_v35 = vmov 839922192  }
   0x2   :  { %26 = vst [vmem:[#allocation1] ss:$2 sm:$0xff] %v201_v0  ;;  %v48_v12 = vld [vmem:[%s236_s1] sm:$0xf]  ;;  %v56_v16 = vand.u32 127, %v55_v15  ;;  %v126_v27 = vshrl.u32 %v55_v15, 7  ;;  %v141_v36 = vunpack.c.l.s4 %v167_v35 }
   0x3   :  { %30 = vst [vmem:[#allocation1 + $0x10] ss:$2 sm:$0xff] %v206_v1  ;;  %158 = vmatpush.msk.msra.mxu0 %vm37_vm0, %v48_v12  ;;  %v89_v21 = vld [vmem:[%s239_s3] sm:$0x1] }
   0x4   :  { %11 = vst [vmem:[#allocation2] sm:$0x1] %v10_v13  ;;  %160 = vmatpush.msk.msra.mxu1 %vm98_vm3, %v89_v21  ;;  %163 = vset.pattern.permute.xlu1 %v126_v27  ;;  %v166_v28 = vld [vmem:[%s238_s4] ss:$0 sm:$0xff]  ;;  %v142_v37 = vunpack.c.0.s8 %v141_v36 }
   0x5   :  { %164 = vset.pattern.permute.xlu0 %v126_v27 }
   0x9   :  { %v27_v2 = vld.sshfl [vmem:[#allocation1] sm:$0xff pattern:$0x75316420]  ;;  %v28_v3 = vld.sshfl [vmem:[#allocation1 + $0x8] sm:$0xff pattern:$0x75316420] }
   0xa   :  { %v38_v4 = vsel %vm37_vm0, %v27_v2, 0.0  ;;  %v39_v5 = vsel %vm37_vm0, %v28_v3, 0.0  ;;  %v31_v7 = vld.sshfl [vmem:[#allocation1 + $0x10] sm:$0xff pattern:$0x75316420] }
   0xb   :  { %v40_v6 = vadd.f32 %v39_v5, %v38_v4  ;;  %v32_v8 = vld.sshfl [vmem:[#allocation1 + $0x18] sm:$0xff pattern:$0x75316420]  ;;  %v43_v9 = vsel %vm37_vm0, %v31_v7, 0.0  ;;  %v165_v22 = vld [vmem:[#allocation2] ss:$0 sm:$0xff] }
   0xc   :  { %v44_v10 = vsel %vm37_vm0, %v32_v8, 0.0 }
   0xd   :  { %41 = vadd.xlane.f32.xlu0 %v40_v6  ;;  %v45_v11 = vadd.f32 %v44_v10, %v43_v9 }
  0x15   :  { %46 = vadd.xlane.f32.xlu0 %v45_v11 }
  0x80   :  { %v42_v14 = vpop.xlane.xlu0 %41 }
  0x81   :  { %v57_v18 = vperm.slane %v42_v14, %v56_v16 }
  0x88   :  { %v47_v17 = vpop.xlane.xlu0 %46 }
  0x89   :  { %v58_v19 = vperm.slane %v47_v17, %v56_v16 }
  0x8b   :  { %v60_v20 = vsel %vm59_vm1, %v58_v19, %v57_v18 }
  0x8c   :  { %159 = vmatmul.msk.f32.vlgmr.msra.gmra.mxu0 %vm61_vm2, %v60_v20 }
 0x109   :  { %v84_v23 = vpop.f32.mrf.mxu0 }
 0x10a   :  { %v85_v24 = vadd.f32 %v165_v22, %v84_v23 }
 0x10c   :  { %v87_v25 = vmax.f32 %v85_v24, 0.0 }
 0x10e   :  { %v88_v26 = vmin.f32 %v87_v25, 6.0 }
 0x110   :  { %161 = vmatmul.msk.f32.vlgmr.msra.gmra.mxu1 %vm94_vm4, %v88_v26 }
 0x18d   :  { %v119_v29 = vpop.f32.mrf.mxu1 }
 0x18e   :  { %v120_v30 = vadd.f32 %v166_v28, %v119_v29 }
 0x190   :  { %v122_v31 = vmax.f32 %v120_v30, 0.0 }
 0x192   :  { %v123_v32 = vmin.f32 %v122_v31, 6.0 }
 0x194   :  { %v124_v33 = vperm.slane %v123_v32, 0  ;;  %v131_v34 = vperm.slane %v123_v32, 1 }
 0x196   :  { %129 = vperm.xlu1 %163, %v124_v33  }
 0x19e   :  { %136 = vperm.xlu1 %163, %v131_v34  }
 0x208   :  { %v130_v38 = vpop.permute.xlu1 %129 }
 0x209   :  { %v143_v39 = vperm.slane %v130_v38, %v142_v37 }
 0x20b   :  { %v150_v40 = vmul.f32 %v143_v39, %v201_v0 }
 0x20d   :  { %152 = vst [vmem:[%s240_s5] sm:$0xff] %v150_v40 }
 0x210   :  { %v137_v41 = vpop.permute.xlu1 %136 }
 0x211   :  { %v147_v42 = vperm.slane %v137_v41, %v142_v37 }
 0x213   :  { %v151_v43 = vmul.f32 %v147_v42, %v206_v1 }
 0x215   :  { %153 = vst [vmem:[%s240_s5 + $0x8] sm:$0xff] %v151_v43 }

</bundles_post_ra>
